<compile_context>
chip_gen: v6e
topology: v6e:2x2x1
jax: 0.10.0
libtpu: 0.0.40
codegen_flags: <defaults>
</compile_context>

<pallas_src>
import functools

import jax
import jax.numpy as jnp
from jax.experimental import pallas as pl
from jax.experimental.pallas import tpu as pltpu


def _round_up(x: int, m: int) -> int:
    return ((x + m - 1) // m) * m


def _pad_dim(d: int) -> int:
    # Lane-dense and MXU-friendly: 128 minimum, multiples of 256 beyond that
    # (256 is a multiple of 128, so v5e's 128-wide MXU is unaffected).
    return 128 if d <= 128 else _round_up(d, 256)


def _prep(a, rows: int, cols: int, dtype):
    """Cast (if needed) then zero-pad (if needed); both skipped when no-ops."""
    if a.dtype != dtype:
        a = a.astype(dtype)
    r, c = a.shape
    if (r, c) != (rows, cols):
        a = jnp.pad(a, ((0, rows - r), (0, cols - c)))
    return a


def _vmem_capacity_bytes() -> int:
    try:
        return int(pltpu.get_tpu_info().vmem_capacity_bytes)
    except Exception:
        return 64 * 1024 * 1024  # conservative fallback (v7x per-TC)


def mlp_kernel(x_ref, w1_ref, b1_ref, w2_ref, b2_ref, o_ref, acc_ref):
    k = pl.program_id(1)

    @pl.when(k == 0)
    def _():
        acc_ref[...] = jnp.zeros_like(acc_ref)

    # fc1 slice (bf16 operands, f32 MXU accumulation) + bias slice + ReLU (f32).
    h = jnp.dot(x_ref[...], w1_ref[...], preferred_element_type=jnp.float32)
    h = jnp.maximum(h + b1_ref[...], 0.0)            # (tm, th) + (1, th)
    # Dropout: eval-mode identity (see TODO at top).
    # fc2 partial: contract this hidden slice into the f32 accumulator.
    acc_ref[...] += jnp.dot(h.astype(w2_ref.dtype), w2_ref[...],
                            preferred_element_type=jnp.float32)

    @pl.when(k == pl.num_programs(1) - 1)
    def _():
        o_ref[...] = (acc_ref[...] + b2_ref[...]).astype(o_ref.dtype)


@functools.partial(jax.jit, static_argnames=("tm", "th"))
def mlp_forward(x, w1, b1, w2, b2, *, tm=256, th=512):
    """x: (N, C_in); w1: (C_in, H); b1: (H,); w2: (H, C_out); b2: (C_out,)."""
    assert tm % 16 == 0 and th % 128 == 0

    n, c_in = x.shape
    hid = w1.shape[1]
    c_out = w2.shape[1]
    out_dtype = x.dtype

    # Lane-dense / MXU-friendly feature padding.
    c_in_p = _pad_dim(c_in)
    c_out_p = _pad_dim(c_out)

    # Hidden-dim chunking: one chunk when the padded H fits inside `th`,
    # otherwise stream the hidden dim in `th`-sized blocks.
    hid_p = _pad_dim(hid)
    if hid_p <= th:
        th_eff = hid_p
    else:
        th_eff = th
        hid_p = _round_up(hid, th_eff)

    # Row tile: multiple of 16 (bf16 packing), shrunk for small N.
    tm_eff = min(tm, _round_up(n, 16))
    n_p = _round_up(n, tm_eff)

    # bf16 matmul operands, f32 biases; cast before pad, skip no-ops.
    xp = _prep(x, n_p, c_in_p, jnp.bfloat16)
    w1p = _prep(w1, c_in_p, hid_p, jnp.bfloat16)
    w2p = _prep(w2, hid_p, c_out_p, jnp.bfloat16)
    b1p = _prep(b1.reshape(1, hid), 1, hid_p, jnp.float32)
    b2p = _prep(b2.reshape(1, c_out), 1, c_out_p, jnp.float32)

    ni = n_p // tm_eff
    nk = hid_p // th_eff
    grid = (ni, nk)

    # Accurate VMEM footprint (x/out tiles and streamed weight blocks are
    # double-buffered by the pipeline; accumulator scratch and the live f32
    # hidden slice are single), with 1.5x margin, capped at ~85% of per-core
    # VMEM capacity.
    out_bytes = jnp.dtype(out_dtype).itemsize
    est = (
        2 * tm_eff * c_in_p * 2            # x tiles (bf16)
        + 2 * c_in_p * th_eff * 2          # streamed w1 blocks (bf16)
        + 2 * 8 * th_eff * 4               # b1 blocks (f32, 8-sublane padded)
        + 2 * th_eff * c_out_p * 2         # streamed w2 blocks (bf16)
        + 2 * 8 * c_out_p * 4              # b2 (f32)
        + 2 * tm_eff * c_out_p * out_bytes # out tiles
        + tm_eff * c_out_p * 4             # f32 accumulator scratch
        + tm_eff * th_eff * 4              # live f32 hidden slice
    )
    vmem_cap = _vmem_capacity_bytes()
    vmem_limit = min(max(int(1.5 * est), 32 * 1024 * 1024),
                     int(0.85 * vmem_cap))

    # Advisory cost hint for XLA's scheduler.
    weight_bytes = (c_in_p * hid_p + hid_p * c_out_p) * 2 + (hid_p + c_out_p) * 4
    weight_reads = ni if nk > 1 else 1     # streamed weights re-read per row tile
    cost = pl.CostEstimate(
        flops=2 * n_p * c_in_p * hid_p + 2 * n_p * hid_p * c_out_p,
        transcendentals=0,
        bytes_accessed=(n_p * c_in_p * 2 + weight_reads * weight_bytes
                        + n_p * c_out_p * out_bytes),
    )

    out_p = pl.pallas_call(
        mlp_kernel,
        out_shape=jax.ShapeDtypeStruct((n_p, c_out_p), out_dtype),
        grid=grid,
        in_specs=[
            pl.BlockSpec((tm_eff, c_in_p), lambda i, k: (i, 0)),   # x: row tile
            pl.BlockSpec((c_in_p, th_eff), lambda i, k: (0, k)),   # w1: H-block
            pl.BlockSpec((1, th_eff), lambda i, k: (0, k)),        # b1: H-block
            pl.BlockSpec((th_eff, c_out_p), lambda i, k: (k, 0)),  # w2: H-block
            pl.BlockSpec((1, c_out_p), lambda i, k: (0, 0)),       # b2: resident
        ],
        out_specs=pl.BlockSpec((tm_eff, c_out_p), lambda i, k: (i, 0)),
        scratch_shapes=[pltpu.VMEM((tm_eff, c_out_p), jnp.float32)],
        compiler_params=pltpu.CompilerParams(
            dimension_semantics=("parallel", "arbitrary"),
            vmem_limit_bytes=vmem_limit,
        ),
        cost_estimate=cost,
    )(xp, w1p, b1p, w2p, b2p)

    return out_p[:n, :c_out]


def init_linear_params(key, fan_in, fan_out, dtype=jnp.float32):
    # PyTorch nn.Linear default init: U(-1/sqrt(fan_in), 1/sqrt(fan_in))
    kw, kb = jax.random.split(key)
    bound = 1.0 / (fan_in ** 0.5)
    w = jax.random.uniform(kw, (fan_in, fan_out), dtype, -bound, bound)
    b = jax.random.uniform(kb, (fan_out,), dtype, -bound, bound)
    return w, b


if __name__ == "__main__":
    key = jax.random.PRNGKey(0)
    k_x, k_fc1, k_fc2 = jax.random.split(key, 3)

    # Small shapes consistent with the module: N rows (nodes), feature dims.
    N, C_IN, HIDDEN, C_OUT = 8, 16, 32, 8

    x = jax.random.normal(k_x, (N, C_IN), jnp.float32)
    w1, b1 = init_linear_params(k_fc1, C_IN, HIDDEN)
    w2, b2 = init_linear_params(k_fc2, HIDDEN, C_OUT)

    out = mlp_forward(x, w1, b1, w2, b2)
    jax.block_until_ready(out)

    # Reference in plain JAX matching the kernel's bf16-operand / f32-accum
    # numerics (eval mode: dropout is identity).
    def bf16(a):
        return a.astype(jnp.bfloat16).astype(jnp.float32)

    h_ref = jnp.maximum(bf16(x) @ bf16(w1) + b1, 0.0)
    ref = bf16(h_ref) @ bf16(w2) + b2

    assert out.shape == (N, C_OUT)
    assert jnp.allclose(out, ref, atol=1e-4, rtol=1e-4), (
        float(jnp.max(jnp.abs(out - ref))))

    # Sanity vs. full-f32 math (looser, bf16-level tolerance).
    ref_f32 = jnp.maximum(x @ w1 + b1, 0.0) @ w2 + b2
    assert jnp.allclose(out, ref_f32, atol=5e-2, rtol=5e-2)

    # Second check: shapes + a small chunk size that exercise the hidden-dim
    # chunking / accumulator path (nk > 1) while staying small.
    N2, C2_IN, HID2, C2_OUT = 48, 24, 256, 10
    k_x2, k_fc1b, k_fc2b = jax.random.split(jax.random.PRNGKey(1), 3)
    x2 = jax.random.normal(k_x2, (N2, C2_IN), jnp.float32)
    w1b, b1b = init_linear_params(k_fc1b, C2_IN, HID2)
    w2b, b2b = init_linear_params(k_fc2b, HID2, C2_OUT)

    out2 = mlp_forward(x2, w1b, b1b, w2b, b2b, th=128)   # 2 hidden chunks
    jax.block_until_ready(out2)

    h2 = jnp.maximum(bf16(x2) @ bf16(w1b) + b1b, 0.0)
    ref2 = bf16(h2) @ bf16(w2b) + b2b
    assert out2.shape == (N2, C2_OUT)
    assert jnp.allclose(out2, ref2, atol=2e-4, rtol=2e-4), (
        float(jnp.max(jnp.abs(out2 - ref2))))

    print("KERNEL_OK")
</pallas_src>

<mosaic_0001>
module attributes {stable_mosaic.version = 11 : i64} {
  func.func @mlp_kernel(%arg0: i32, %arg1: i32, %arg2: memref<16x128xbf16, #tpu.memory_space<vmem>>, %arg3: memref<128x128xbf16, #tpu.memory_space<vmem>>, %arg4: memref<1x128xf32, #tpu.memory_space<vmem>>, %arg5: memref<128x128xbf16, #tpu.memory_space<vmem>>, %arg6: memref<1x128xf32, #tpu.memory_space<vmem>>, %arg7: memref<16x128xf32, #tpu.memory_space<vmem>>, %arg8: memref<16x128xf32, #tpu.memory_space<vmem>>) attributes {dimension_semantics = [#tpu.dimension_semantics<parallel>, #tpu.dimension_semantics<arbitrary>], iteration_bounds = array<i64: 1, 1>, scalar_prefetch = 0 : i64, scratch_operands = 1 : i64, tpu.core_type = #tpu.core_type<tc>, window_params = [{transform_indices = @transform_0, window_bounds = array<i64: 16, 128>}, {transform_indices = @transform_1, window_bounds = array<i64: 128, 128>}, {transform_indices = @transform_2, window_bounds = array<i64: 1, 128>}, {transform_indices = @transform_3, window_bounds = array<i64: 128, 128>}, {pipeline_mode = #tpu.pipeline_mode<synchronous>, transform_indices = @transform_4, window_bounds = array<i64: 1, 128>}, {transform_indices = @transform_5, window_bounds = array<i64: 16, 128>}]} {
    %c0_i32 = arith.constant 0 : i32
    %0 = arith.cmpi eq, %arg1, %c0_i32 : i32
    %1 = arith.extui %0 : i1 to i32
    %c0_i32_0 = arith.constant 0 : i32
    %2 = arith.cmpi ne, %1, %c0_i32_0 : i32
    scf.if %2 {
      %cst_16 = arith.constant 0.000000e+00 : f32
      %20 = vector.broadcast %cst_16 : f32 to vector<16x128xf32>
      %c0_17 = arith.constant 0 : index
      %c0_18 = arith.constant 0 : index
      %21 = vector.load %arg8[%c0_17, %c0_18] : memref<16x128xf32, #tpu.memory_space<vmem>>, vector<16x128xf32>
      tpu.vector_store %arg8[%c0_17, %c0_18], %20 {strides = array<i32>} : memref<16x128xf32, #tpu.memory_space<vmem>>, vector<16x128xf32>,
    } else {
    }
    %c0 = arith.constant 0 : index
    %c0_1 = arith.constant 0 : index
    %3 = vector.load %arg2[%c0, %c0_1] : memref<16x128xbf16, #tpu.memory_space<vmem>>, vector<16x128xbf16>
    %c0_2 = arith.constant 0 : index
    %c0_3 = arith.constant 0 : index
    %4 = vector.load %arg3[%c0_2, %c0_3] : memref<128x128xbf16, #tpu.memory_space<vmem>>, vector<128x128xbf16>
    %cst = arith.constant dense<0.000000e+00> : vector<16x128xf32>
    %5 = tpu.matmul %3, %4, %cst {dimension_numbers = #tpu.dot_dimension_numbers<[1], [0], [0], [1], [0, 0, 1, 1], [], []>} : vector<16x128xbf16>, vector<128x128xbf16>, vector<16x128xf32> -> vector<16x128xf32>
    %c0_4 = arith.constant 0 : index
    %c0_5 = arith.constant 0 : index
    %6 = vector.load %arg4[%c0_4, %c0_5] : memref<1x128xf32, #tpu.memory_space<vmem>>, vector<1x128xf32>
    %7 = vector.broadcast %6 : vector<1x128xf32> to vector<16x128xf32>
    %8 = arith.addf %5, %7 : vector<16x128xf32>
    %cst_6 = arith.constant 0.000000e+00 : f32
    %9 = vector.broadcast %cst_6 : f32 to vector<16x128xf32>
    %10 = arith.maximumf %8, %9 : vector<16x128xf32>
    %c0_7 = arith.constant 0 : index
    %c0_8 = arith.constant 0 : index
    %11 = vector.load %arg8[%c0_7, %c0_8] : memref<16x128xf32, #tpu.memory_space<vmem>>, vector<16x128xf32>
    %12 = arith.truncf %10 : vector<16x128xf32> to vector<16x128xbf16>
    %c0_9 = arith.constant 0 : index
    %c0_10 = arith.constant 0 : index
    %13 = vector.load %arg5[%c0_9, %c0_10] : memref<128x128xbf16, #tpu.memory_space<vmem>>, vector<128x128xbf16>
    %cst_11 = arith.constant dense<0.000000e+00> : vector<16x128xf32>
    %14 = tpu.matmul %12, %13, %cst_11 {dimension_numbers = #tpu.dot_dimension_numbers<[1], [0], [0], [1], [0, 0, 1, 1], [], []>} : vector<16x128xbf16>, vector<128x128xbf16>, vector<16x128xf32> -> vector<16x128xf32>
    %15 = arith.addf %11, %14 : vector<16x128xf32>
    %c0_12 = arith.constant 0 : index
    %c0_13 = arith.constant 0 : index
    %16 = vector.load %arg8[%c0_12, %c0_13] : memref<16x128xf32, #tpu.memory_space<vmem>>, vector<16x128xf32>
    tpu.vector_store %arg8[%c0_12, %c0_13], %15 {strides = array<i32>} : memref<16x128xf32, #tpu.memory_space<vmem>>, vector<16x128xf32>,
    %c0_i32_14 = arith.constant 0 : i32
    %17 = arith.cmpi eq, %arg1, %c0_i32_14 : i32
    %18 = arith.extui %17 : i1 to i32
    %c0_i32_15 = arith.constant 0 : i32
    %19 = arith.cmpi ne, %18, %c0_i32_15 : i32
    scf.if %19 {
      %c0_16 = arith.constant 0 : index
      %c0_17 = arith.constant 0 : index
      %20 = vector.load %arg8[%c0_16, %c0_17] : memref<16x128xf32, #tpu.memory_space<vmem>>, vector<16x128xf32>
      %c0_18 = arith.constant 0 : index
      %c0_19 = arith.constant 0 : index
      %21 = vector.load %arg6[%c0_18, %c0_19] : memref<1x128xf32, #tpu.memory_space<vmem>>, vector<1x128xf32>
      %22 = vector.broadcast %21 : vector<1x128xf32> to vector<16x128xf32>
      %23 = arith.addf %20, %22 : vector<16x128xf32>
      %c0_20 = arith.constant 0 : index
      %c0_21 = arith.constant 0 : index
      %24 = vector.load %arg7[%c0_20, %c0_21] : memref<16x128xf32, #tpu.memory_space<vmem>>, vector<16x128xf32>
      tpu.vector_store %arg7[%c0_20, %c0_21], %23 {strides = array<i32>} : memref<16x128xf32, #tpu.memory_space<vmem>>, vector<16x128xf32>,
    } else {
    }
    return
  }
  func.func @transform_0(%arg0: i32, %arg1: i32) -> (i32, i32) {
    %c0_i32 = arith.constant 0 : i32
    %c0_i32_0 = arith.constant 0 : i32
    return %arg0, %c0_i32 : i32, i32
  }
  func.func @transform_1(%arg0: i32, %arg1: i32) -> (i32, i32) {
    %c0_i32 = arith.constant 0 : i32
    %c0_i32_0 = arith.constant 0 : i32
    return %c0_i32, %arg1 : i32, i32
  }
  func.func @transform_2(%arg0: i32, %arg1: i32) -> (i32, i32) {
    %c0_i32 = arith.constant 0 : i32
    %c0_i32_0 = arith.constant 0 : i32
    return %c0_i32, %arg1 : i32, i32
  }
  func.func @transform_3(%arg0: i32, %arg1: i32) -> (i32, i32) {
    %c0_i32 = arith.constant 0 : i32
    %c0_i32_0 = arith.constant 0 : i32
    return %arg1, %c0_i32 : i32, i32
  }
  func.func @transform_4(%arg0: i32, %arg1: i32) -> (i32, i32) {
    %c0_i32 = arith.constant 0 : i32
    %c0_i32_0 = arith.constant 0 : i32
    %c0_i32_1 = arith.constant 0 : i32
    return %c0_i32, %c0_i32_0 : i32, i32
  }
  func.func @transform_5(%arg0: i32, %arg1: i32) -> (i32, i32) {
    %c0_i32 = arith.constant 0 : i32
    %c0_i32_0 = arith.constant 0 : i32
    return %arg0, %c0_i32 : i32, i32
  }
}

</mosaic_0001>

<bundles_post_ra>
// kernel: mlp_forward.1
= control target key start
LH: loop header
LB: loop body
LE: loop exit
PB: predicated region body
PF: predicated region fallthrough
CT: control target
= control target key end

     0   :  { %v377_v0 = vmov 0.0   ;;  %vm378_vm0 = vmmov 0   ;;  %s472_s1 = inlined_call_operand.vmem [shape: bf16[128,128], index: 1, kind: input, shape index: {}]   ;;  %s473_s3 = inlined_call_operand.vmem [shape: bf16[128,128], index: 3, kind: input, shape index: {}]   ;;  %s474_s0 = inlined_call_operand.vmem [shape: bf16[16,128], index: 0, kind: input, shape index: {}]   ;;  %s475_s2 = inlined_call_operand.vmem [shape: f32[1,128], index: 2, kind: input, shape index: {}]   ;;  %s476_s4 = inlined_call_operand.vmem [shape: f32[1,128], index: 4, kind: input, shape index: {}]   ;;  %s477_s5 = inlined_call_operand.vmem [shape: f32[16,128], index: 5, kind: output, shape index: {}]  }
   0x1   :  { %318 = vmatprep.subr.bf16.mxu0 %v377_v0  ;;  %v360_v1 = vld [vmem:[%s472_s1 + $0x38] sm:$0xff]   ;;  %334 = vmatprep.mubr.msk.bf16.mxu0 %vm378_vm0, %v377_v0  ;;  %v361_v2 = vld [vmem:[%s472_s1 + $0x30] sm:$0xff]   ;;  %v362_v3 = vld [vmem:[%s472_s1 + $0x28] sm:$0xff]  }
   0x2   :  { %338 = vmatprep.subr.bf16.mxu1 %v377_v0  ;;  %354 = vmatprep.mubr.msk.bf16.mxu1 %vm378_vm0, %v377_v0  ;;  %v369_v4 = vld [vmem:[%s473_s3 + $0x38] sm:$0xff]   ;;  %v363_v5 = vld [vmem:[%s472_s1 + $0x20] sm:$0xff]   ;;  %v370_v6 = vld [vmem:[%s473_s3 + $0x30] sm:$0xff]  }
   0x3   :  { %319 = vmatpush3.bf16.msra.mxu0 %v360_v1  ;;  %339 = vmatpush3.bf16.msra.mxu1 %v369_v4  ;;  %v364_v7 = vld [vmem:[%s472_s1 + $0x18] sm:$0xff]   ;;  %v371_v8 = vld [vmem:[%s473_s3 + $0x28] sm:$0xff]   ;;  %v365_v9 = vld [vmem:[%s472_s1 + $0x10] sm:$0xff]  }
   0x4   :  { %320 = vmatprep.subr.bf16.mxu0 %v377_v0  ;;  %340 = vmatprep.subr.bf16.mxu1 %v377_v0  ;;  %v372_v10 = vld [vmem:[%s473_s3 + $0x20] sm:$0xff]   ;;  %v366_v11 = vld [vmem:[%s472_s1 + $0x8] sm:$0xff]   ;;  %v373_v12 = vld [vmem:[%s473_s3 + $0x18] sm:$0xff]  }
   0x5   :  { %v367_v13 = vld [vmem:[%s472_s1] sm:$0xff]   ;;  %v374_v15 = vld [vmem:[%s473_s3 + $0x10] sm:$0xff]   ;;  %v375_v16 = vld [vmem:[%s473_s3 + $0x8] sm:$0xff]  }
   0x6   :  { %v368_v14 = vld [vmem:[%s474_s0] sm:$0xff]  }
   0x7   :  { %321 = vmatpush3.bf16.msra.mxu0 %v361_v2  ;;  %341 = vmatpush3.bf16.msra.mxu1 %v370_v6  ;;  %v376_v17 = vld [vmem:[%s473_s3] sm:$0xff]  }
   0x8   :  { %322 = vmatprep.subr.bf16.mxu0 %v377_v0  ;;  %342 = vmatprep.subr.bf16.mxu1 %v377_v0  ;;  %v281_v18 = vld [vmem:[%s475_s2] ss:$0 sm:$0xff] }
   0x9   :  { %v299_v28 = vld [vmem:[%s476_s4] ss:$0 sm:$0xff] }
   0xb   :  { %323 = vmatpush3.bf16.msra.mxu0 %v362_v3  ;;  %343 = vmatpush3.bf16.msra.mxu1 %v371_v8 }
   0xc   :  { %324 = vmatprep.subr.bf16.mxu0 %v377_v0  ;;  %344 = vmatprep.subr.bf16.mxu1 %v377_v0 }
   0xf   :  { %325 = vmatpush3.bf16.msra.mxu0 %v363_v5  ;;  %345 = vmatpush3.bf16.msra.mxu1 %v372_v10 }
  0x10   :  { %326 = vmatprep.subr.bf16.mxu0 %v377_v0  ;;  %346 = vmatprep.subr.bf16.mxu1 %v377_v0 }
  0x13   :  { %327 = vmatpush3.bf16.msra.mxu0 %v364_v7  ;;  %347 = vmatpush3.bf16.msra.mxu1 %v373_v12 }
  0x14   :  { %328 = vmatprep.subr.bf16.mxu0 %v377_v0  ;;  %348 = vmatprep.subr.bf16.mxu1 %v377_v0 }
  0x17   :  { %329 = vmatpush3.bf16.msra.mxu0 %v365_v9  ;;  %349 = vmatpush3.bf16.msra.mxu1 %v374_v15 }
  0x18   :  { %330 = vmatprep.subr.bf16.mxu0 %v377_v0  ;;  %350 = vmatprep.subr.bf16.mxu1 %v377_v0 }
  0x1b   :  { %331 = vmatpush3.bf16.msra.mxu0 %v366_v11  ;;  %351 = vmatpush3.bf16.msra.mxu1 %v375_v16 }
  0x1c   :  { %332 = vmatprep.subr.bf16.mxu0 %v377_v0  ;;  %352 = vmatprep.subr.bf16.mxu1 %v377_v0 }
  0x1f   :  { %333 = vmatpush3.bf16.msra.mxu0 %v367_v13  ;;  %353 = vmatpush3.bf16.msra.mxu1 %v376_v17 }
  0x22   :  { %335 = vmatmul.mubr.bf16.vlgmr.msra.gmra.mxu0 %v368_v14 }
  0xe2   :  { %v140_v19 = vpop.f32.mrf.mxu0 }
  0xe3   :  { %v141_v21 = vadd.f32 %v281_v18, %v140_v19 }
  0xe4   :  { %v336_v20 = vpop.f32.mrf.mxu0 }
  0xe5   :  { %v147_v25 = vmax.f32 %v141_v21, 0.0 }
  0xe6   :  { %v143_v22 = vpop.f32.mrf.mxu0 }
  0xe7   :  { %v144_v23 = vadd.f32 %v281_v18, %v143_v22 }
  0xe8   :  { %v337_v24 = vpop.f32.mrf.mxu0 }
  0xe9   :  { %v148_v26 = vmax.f32 %v144_v23, 0.0 }
  0xeb   :  { %v151_v27 = vpack.c.bf16 %v148_v26, %v147_v25 }
  0xed   :  { %355 = vmatmul.mubr.bf16.vlgmr.msra.gmra.mxu1 %v151_v27 }
 0x1ad   :  { %v250_v29 = vpop.f32.mrf.mxu1 }
 0x1ae   :  { %v273_v30 = vadd.f32 %v299_v28, %v250_v29 }
 0x1af   :  { %v356_v31 = vpop.f32.mrf.mxu1 }
 0x1b0   :  { %275 = vst [vmem:[%s477_s5] sm:$0xff] %v273_v30 }
 0x1b1   :  { %v253_v32 = vpop.f32.mrf.mxu1 }
 0x1b2   :  { %v274_v33 = vadd.f32 %v299_v28, %v253_v32 }
 0x1b3   :  { %v357_v34 = vpop.f32.mrf.mxu1 }
 0x1b4   :  { %276 = vst [vmem:[%s477_s5 + $0x8] sm:$0xff] %v274_v33 }

</bundles_post_ra>
